<compile_context>
chip_gen: v7x
topology: tpu7x:2x2x1
jax: 0.10.0
libtpu: 0.0.40
codegen_flags: <defaults>
</compile_context>

<pallas_src>
import jax
import jax.numpy as jnp
from jax import lax
from jax.experimental import pallas as pl
from jax.experimental.pallas import tpu as pltpu


def _round_up(a: int, b: int) -> int:
    return ((a + b - 1) // b) * b


def moving_avg_pallas(x: jax.Array, kernel_size: int, stride: int) -> jax.Array:
    """Equivalent of moving_avg(kernel_size, stride)(x) for x of shape (B, L, C)."""
    B, L, C = x.shape
    k = int(kernel_size)
    s = int(stride)
    p = (k - 1) // 2                    # replicate padding on each side
    L_pad = L + 2 * p
    L_out = (L_pad - k) // s + 1
    if L_out <= 0:
        return jnp.zeros((B, 0, C), x.dtype)

    # The kernel always produces the dense (stride=1) moving average of length
    # L_dense; stride > 1 is a cheap subsample of that result in the wrapper.
    L_dense = L_pad - k + 1
    RH = k - 1 - p                      # rows of right halo needed (>= p)
    HB = _round_up(max(p, RH, 1), 8)    # halo block rows (sublane aligned)

    # Time tile: a multiple of HB (so halo blocks land on block boundaries),
    # ~512 sublanes for good DMA efficiency, but no larger than needed.
    TL = _round_up(min(512, _round_up(L_dense, 8)), HB)
    nL = pl.cdiv(L_dense, TL)
    nHB = pl.cdiv(L, HB)
    r = TL // HB                        # halo blocks per time tile

    # Channel tile: full C when modest (C < 128 keeps last dim == full dim),
    # otherwise 512-lane chunks.  (For C < 128 we accept masked stores instead
    # of paying an HBM transpose in the wrapper.)
    TC = C if C <= 512 else 512
    nC = pl.cdiv(C, TC)

    SLEN = 2 * HB + TL                  # [left halo | center | right halo]
    off = HB - p                        # buf row of tap 0 of output row 0
    inv_k = 1.0 / float(k)

    def kernel(lh_ref, c_ref, rh_ref, o_ref, buf):
        j = pl.program_id(2)            # time-tile index
        base = j * TL                   # first original row of the center block

        # Assemble [left halo | center | right halo] in VMEM scratch (f32).
        buf[0:HB, :] = lh_ref[...].astype(jnp.float32)
        buf[HB:HB + TL, :] = c_ref[...].astype(jnp.float32)
        buf[HB + TL:SLEN, :] = rh_ref[...].astype(jnp.float32)

        # In-kernel replicate padding: only tiles touching the sequence
        # boundaries rewrite out-of-range rows with x[b,0,:] / x[b,L-1,:].
        @pl.when(jnp.logical_or(base - HB < 0, base + TL + HB > L))
        def _():
            m = lax.broadcasted_iota(jnp.int32, (SLEN, 1), 0)
            g = (base - HB) + m                       # original row index per buf row
            first_row = buf[HB:HB + 1, :]             # == x[b, 0, :] when j == 0
            last_idx = jnp.clip(L - 1 + HB - base, 0, SLEN - 1)
            last_row = buf[pl.ds(last_idx, 1), :]     # == x[b, L-1, :] when needed
            cur = buf[...]
            cur = jnp.where(g < 0, first_row, cur)
            cur = jnp.where(g >= L, last_row, cur)
            buf[...] = cur

        # Windowed sum: k static, contiguous sublane-offset reads from VMEM.
        acc = buf[off:off + TL, :]
        for i in range(1, k):
            acc = acc + buf[off + i:off + i + TL, :]
        o_ref[...] = (acc * inv_k).astype(o_ref.dtype)

    dense = pl.pallas_call(
        kernel,
        out_shape=jax.ShapeDtypeStruct((B, L_dense, C), x.dtype),
        grid_spec=pltpu.PrefetchScalarGridSpec(
            num_scalar_prefetch=0,
            grid=(B, nC, nL),
            in_specs=[
                # left halo: last HB rows before this time tile (clamped at 0;
                # the j == 0 contents are overwritten by the replicate fixup)
                pl.BlockSpec((None, HB, TC),
                             lambda b, ci, j: (b, jnp.maximum(j * r - 1, 0), ci)),
                # center tile
                pl.BlockSpec((None, TL, TC), lambda b, ci, j: (b, j, ci)),
                # right halo: first HB rows after this time tile (clamped at end)
                pl.BlockSpec((None, HB, TC),
                             lambda b, ci, j: (b, jnp.minimum((j + 1) * r, nHB - 1), ci)),
            ],
            out_specs=pl.BlockSpec((None, TL, TC), lambda b, ci, j: (b, j, ci)),
            scratch_shapes=[pltpu.VMEM((SLEN, TC), jnp.float32)],
        ),
        compiler_params=pltpu.CompilerParams(
            dimension_semantics=("parallel", "parallel", "parallel"),
            vmem_limit_bytes=32 * 1024 * 1024,
        ),
    )(x, x, x)

    if s == 1:
        return dense
    # TODO(synk): stride > 1 subsamples the dense stride-1 kernel result here
    # (wrapper-side) rather than doing strided sublane reads inside the kernel.
    return dense[:, ::s, :][:, :L_out, :]


def moving_avg_ref(x: jax.Array, kernel_size: int, stride: int) -> jax.Array:
    """Pure-JAX reference mirroring the PyTorch module exactly."""
    p = (kernel_size - 1) // 2
    front = jnp.repeat(x[:, 0:1, :], p, axis=1)
    end = jnp.repeat(x[:, -1:, :], p, axis=1)
    xp = jnp.concatenate([front, x, end], axis=1)      # (B, L_pad, C)
    L_pad = xp.shape[1]
    L_out = (L_pad - kernel_size) // stride + 1
    acc = jnp.zeros((x.shape[0], L_out, x.shape[2]), jnp.float32)
    for i in range(kernel_size):
        acc = acc + xp[:, i:i + (L_out - 1) * stride + 1:stride, :].astype(jnp.float32)
    return (acc / kernel_size).astype(x.dtype)


if __name__ == "__main__":
    key = jax.random.PRNGKey(0)

    # Primary config consistent with the module's (B, L, C) input.
    B, L, C = 2, 16, 32
    kernel_size, stride = 5, 1          # nn.AvgPool1d has no learnable parameters
    x = jax.random.normal(key, (B, L, C), dtype=jnp.float32)

    out = jax.block_until_ready(moving_avg_pallas(x, kernel_size, stride))
    ref = moving_avg_ref(x, kernel_size, stride)
    assert out.shape == ref.shape, (out.shape, ref.shape)
    assert jnp.allclose(out, ref, atol=1e-5, rtol=1e-5), "mismatch vs reference"

    # Extra configs: multi-tile time axis with halos / boundary replication,
    # even kernel_size, and stride > 1.
    for (Bt, Lt, Ct, kt, st) in [(2, 700, 7, 25, 1), (2, 30, 4, 4, 2)]:
        xt = jax.random.normal(jax.random.PRNGKey(1), (Bt, Lt, Ct), dtype=jnp.float32)
        o = jax.block_until_ready(moving_avg_pallas(xt, kt, st))
        rf = moving_avg_ref(xt, kt, st)
        assert o.shape == rf.shape, (o.shape, rf.shape)
        assert jnp.allclose(o, rf, atol=1e-5, rtol=1e-5), ("mismatch", kt, st)

    print("KERNEL_OK")
</pallas_src>

<mosaic_0001>
module attributes {stable_mosaic.version = 11 : i64} {
  func.func @kernel(%arg0: i32, %arg1: i32, %arg2: i32, %arg3: memref<1x8x32xf32, #tpu.memory_space<vmem>>, %arg4: memref<1x16x32xf32, #tpu.memory_space<vmem>>, %arg5: memref<1x8x32xf32, #tpu.memory_space<vmem>>, %arg6: memref<1x16x32xf32, #tpu.memory_space<vmem>>, %arg7: memref<32x32xf32, #tpu.memory_space<vmem>>) attributes {dimension_semantics = [#tpu.dimension_semantics<parallel>, #tpu.dimension_semantics<parallel>, #tpu.dimension_semantics<parallel>], iteration_bounds = array<i64: 2, 1, 1>, scalar_prefetch = 0 : i64, scratch_operands = 1 : i64, tpu.core_type = #tpu.core_type<tc>, window_params = [{transform_indices = @transform_0, window_bounds = array<i64: 1, 8, 32>}, {transform_indices = @transform_1, window_bounds = array<i64: 1, 16, 32>}, {transform_indices = @transform_2, window_bounds = array<i64: 1, 8, 32>}, {transform_indices = @transform_3, window_bounds = array<i64: 1, 16, 32>}]} {
    %c16_i32 = arith.constant 16 : i32
    %0 = arith.muli %arg2, %c16_i32 : i32
    %c0 = arith.constant 0 : index
    %c0_0 = arith.constant 0 : index
    %c0_1 = arith.constant 0 : index
    %1 = vector.load %arg3[%c0, %c0_0, %c0_1] : memref<1x8x32xf32, #tpu.memory_space<vmem>>, vector<1x8x32xf32>
    %2 = vector.shape_cast %1 : vector<1x8x32xf32> to vector<8x32xf32>
    %c0_2 = arith.constant 0 : index
    %c0_3 = arith.constant 0 : index
    %3 = vector.load %arg7[%c0_2, %c0_3] : memref<32x32xf32, #tpu.memory_space<vmem>>, vector<8x32xf32>
    tpu.vector_store %arg7[%c0_2, %c0_3], %2 {strides = array<i32>} : memref<32x32xf32, #tpu.memory_space<vmem>>, vector<8x32xf32>,
    %c0_4 = arith.constant 0 : index
    %c0_5 = arith.constant 0 : index
    %c0_6 = arith.constant 0 : index
    %4 = vector.load %arg4[%c0_4, %c0_5, %c0_6] : memref<1x16x32xf32, #tpu.memory_space<vmem>>, vector<1x16x32xf32>
    %5 = vector.shape_cast %4 : vector<1x16x32xf32> to vector<16x32xf32>
    %c8 = arith.constant 8 : index
    %c0_7 = arith.constant 0 : index
    %6 = vector.load %arg7[%c8, %c0_7] : memref<32x32xf32, #tpu.memory_space<vmem>>, vector<16x32xf32>
    tpu.vector_store %arg7[%c8, %c0_7], %5 {strides = array<i32>} : memref<32x32xf32, #tpu.memory_space<vmem>>, vector<16x32xf32>,
    %c0_8 = arith.constant 0 : index
    %c0_9 = arith.constant 0 : index
    %c0_10 = arith.constant 0 : index
    %7 = vector.load %arg5[%c0_8, %c0_9, %c0_10] : memref<1x8x32xf32, #tpu.memory_space<vmem>>, vector<1x8x32xf32>
    %8 = vector.shape_cast %7 : vector<1x8x32xf32> to vector<8x32xf32>
    %c24 = arith.constant 24 : index
    %c0_11 = arith.constant 0 : index
    %9 = vector.load %arg7[%c24, %c0_11] : memref<32x32xf32, #tpu.memory_space<vmem>>, vector<8x32xf32>
    tpu.vector_store %arg7[%c24, %c0_11], %8 {strides = array<i32>} : memref<32x32xf32, #tpu.memory_space<vmem>>, vector<8x32xf32>,
    %c8_i32 = arith.constant 8 : i32
    %10 = arith.subi %0, %c8_i32 : i32
    %c0_i32 = arith.constant 0 : i32
    %11 = arith.cmpi slt, %10, %c0_i32 : i32
    %c16_i32_12 = arith.constant 16 : i32
    %12 = arith.addi %0, %c16_i32_12 : i32
    %c8_i32_13 = arith.constant 8 : i32
    %13 = arith.addi %12, %c8_i32_13 : i32
    %c16_i32_14 = arith.constant 16 : i32
    %14 = arith.cmpi sgt, %13, %c16_i32_14 : i32
    %15 = arith.ori %11, %14 : i1
    %16 = arith.extui %15 : i1 to i32
    %c0_i32_15 = arith.constant 0 : i32
    %17 = arith.cmpi ne, %16, %c0_i32_15 : i32
    scf.if %17 {
      %32 = tpu.iota {dimensions = array<i32: 0>} : vector<32x1xi32>
      %c8_i32_25 = arith.constant 8 : i32
      %33 = arith.subi %0, %c8_i32_25 : i32
      %34 = vector.broadcast %33 : i32 to vector<32x1xi32>
      %35 = arith.addi %34, %32 : vector<32x1xi32>
      %c8_26 = arith.constant 8 : index
      %c0_27 = arith.constant 0 : index
      %36 = vector.load %arg7[%c8_26, %c0_27] : memref<32x32xf32, #tpu.memory_space<vmem>>, vector<1x32xf32>
      %c23_i32 = arith.constant 23 : i32
      %37 = arith.subi %c23_i32, %0 : i32
      %c0_i32_28 = arith.constant 0 : i32
      %c31_i32 = arith.constant 31 : i32
      %38 = arith.maxsi %c0_i32_28, %37 : i32
      %39 = arith.minsi %c31_i32, %38 : i32
      %40 = arith.index_cast %39 : i32 to index
      %c0_29 = arith.constant 0 : index
      %41 = vector.load %arg7[%40, %c0_29] : memref<32x32xf32, #tpu.memory_space<vmem>>, vector<1x32xf32>
      %c0_30 = arith.constant 0 : index
      %c0_31 = arith.constant 0 : index
      %42 = vector.load %arg7[%c0_30, %c0_31] : memref<32x32xf32, #tpu.memory_space<vmem>>, vector<32x32xf32>
      %c0_i32_32 = arith.constant 0 : i32
      %43 = vector.broadcast %c0_i32_32 : i32 to vector<32x1xi32>
      %44 = arith.cmpi slt, %35, %43 : vector<32x1xi32>
      %45 = vector.shape_cast %44 : vector<32x1xi1> to vector<32x1xi1>
      %46 = vector.broadcast %45 : vector<32x1xi1> to vector<32x32xi1>
      %47 = vector.shape_cast %36 : vector<1x32xf32> to vector<1x32xf32>
      %48 = vector.broadcast %47 : vector<1x32xf32> to vector<32x32xf32>
      %49 = arith.select %46, %48, %42 : vector<32x32xi1>, vector<32x32xf32>
      %c16_i32_33 = arith.constant 16 : i32
      %50 = vector.broadcast %c16_i32_33 : i32 to vector<32x1xi32>
      %51 = arith.cmpi sge, %35, %50 : vector<32x1xi32>
      %52 = vector.shape_cast %51 : vector<32x1xi1> to vector<32x1xi1>
      %53 = vector.broadcast %52 : vector<32x1xi1> to vector<32x32xi1>
      %54 = vector.shape_cast %41 : vector<1x32xf32> to vector<1x32xf32>
      %55 = vector.broadcast %54 : vector<1x32xf32> to vector<32x32xf32>
      %56 = arith.select %53, %55, %49 : vector<32x32xi1>, vector<32x32xf32>
      %c0_34 = arith.constant 0 : index
      %c0_35 = arith.constant 0 : index
      %57 = vector.load %arg7[%c0_34, %c0_35] : memref<32x32xf32, #tpu.memory_space<vmem>>, vector<32x32xf32>
      tpu.vector_store %arg7[%c0_34, %c0_35], %56 {strides = array<i32>} : memref<32x32xf32, #tpu.memory_space<vmem>>, vector<32x32xf32>,
    } else {
    }
    %c6 = arith.constant 6 : index
    %c0_16 = arith.constant 0 : index
    %18 = vector.load %arg7[%c6, %c0_16] : memref<32x32xf32, #tpu.memory_space<vmem>>, vector<16x32xf32>
    %c7 = arith.constant 7 : index
    %c0_17 = arith.constant 0 : index
    %19 = vector.load %arg7[%c7, %c0_17] : memref<32x32xf32, #tpu.memory_space<vmem>>, vector<16x32xf32>
    %20 = arith.addf %18, %19 : vector<16x32xf32>
    %c8_18 = arith.constant 8 : index
    %c0_19 = arith.constant 0 : index
    %21 = vector.load %arg7[%c8_18, %c0_19] : memref<32x32xf32, #tpu.memory_space<vmem>>, vector<16x32xf32>
    %22 = arith.addf %20, %21 : vector<16x32xf32>
    %c9 = arith.constant 9 : index
    %c0_20 = arith.constant 0 : index
    %23 = vector.load %arg7[%c9, %c0_20] : memref<32x32xf32, #tpu.memory_space<vmem>>, vector<16x32xf32>
    %24 = arith.addf %22, %23 : vector<16x32xf32>
    %c10 = arith.constant 10 : index
    %c0_21 = arith.constant 0 : index
    %25 = vector.load %arg7[%c10, %c0_21] : memref<32x32xf32, #tpu.memory_space<vmem>>, vector<16x32xf32>
    %26 = arith.addf %24, %25 : vector<16x32xf32>
    %cst = arith.constant 2.000000e-01 : f32
    %27 = vector.broadcast %cst : f32 to vector<16x32xf32>
    %28 = arith.mulf %26, %27 : vector<16x32xf32>
    %c0_22 = arith.constant 0 : index
    %c0_23 = arith.constant 0 : index
    %c0_24 = arith.constant 0 : index
    %29 = vector.load %arg6[%c0_22, %c0_23, %c0_24] : memref<1x16x32xf32, #tpu.memory_space<vmem>>, vector<1x16x32xf32>
    %30 = vector.shape_cast %29 : vector<1x16x32xf32> to vector<16x32xf32>
    %31 = vector.shape_cast %28 : vector<16x32xf32> to vector<1x16x32xf32>
    tpu.vector_store %arg6[%c0_22, %c0_23, %c0_24], %31 {strides = array<i32>} : memref<1x16x32xf32, #tpu.memory_space<vmem>>, vector<1x16x32xf32>,
    return
  }
  func.func @transform_0(%arg0: i32, %arg1: i32, %arg2: i32) -> (i32, i32, i32) {
    %c2_i32 = arith.constant 2 : i32
    %0 = arith.muli %arg2, %c2_i32 : i32
    %c1_i32 = arith.constant 1 : i32
    %1 = arith.subi %0, %c1_i32 : i32
    %c0_i32 = arith.constant 0 : i32
    %2 = arith.maxsi %1, %c0_i32 : i32
    %c0_i32_0 = arith.constant 0 : i32
    return %arg0, %2, %arg1 : i32, i32, i32
  }
  func.func @transform_1(%arg0: i32, %arg1: i32, %arg2: i32) -> (i32, i32, i32) {
    %c0_i32 = arith.constant 0 : i32
    return %arg0, %arg2, %arg1 : i32, i32, i32
  }
  func.func @transform_2(%arg0: i32, %arg1: i32, %arg2: i32) -> (i32, i32, i32) {
    %c1_i32 = arith.constant 1 : i32
    %0 = arith.addi %arg2, %c1_i32 : i32
    %c2_i32 = arith.constant 2 : i32
    %1 = arith.muli %0, %c2_i32 : i32
    %c1_i32_0 = arith.constant 1 : i32
    %2 = arith.minsi %1, %c1_i32_0 : i32
    %c0_i32 = arith.constant 0 : i32
    return %arg0, %2, %arg1 : i32, i32, i32
  }
  func.func @transform_3(%arg0: i32, %arg1: i32, %arg2: i32) -> (i32, i32, i32) {
    %c0_i32 = arith.constant 0 : i32
    return %arg0, %arg2, %arg1 : i32, i32, i32
  }
}

</mosaic_0001>

<bundles_post_ra>
// kernel: tpu_custom_call.1
= control target key start
LH: loop header
LB: loop body
LE: loop exit
PB: predicated region body
PF: predicated region fallthrough
CT: control target
= control target key end

     0   :  { %s1188_s0 = inlined_call_operand.hbm [shape: f32[2,16,32], index: 0, kind: input, shape index: {}]   ;;  %s1189_s1 = inlined_call_operand.hbm [shape: f32[2,16,32], index: 1, kind: input, shape index: {}]   ;;  %s1190_s2 = inlined_call_operand.hbm [shape: f32[2,16,32], index: 2, kind: input, shape index: {}]   ;;  %s1191_s3 = inlined_call_operand.hbm [shape: f32[2,16,32], index: 3, kind: output, shape index: {}]  }
   0x1   :  { %1198 = sst [smem:[#allocation16_spill]] %s1189_s1 }
   0x2   :  { %8 = vsyncpa [#allocation4], 0 }
   0x3   :  { %10 = vsyncpa [#allocation4 + $0x1], 0 }
   0x4   :  { %11 = vsyncpa [#allocation7], 0 }
   0x5   :  { %13 = vsyncpa [#allocation7 + $0x1], 0 }
   0x6   :  { %14 = vsyncpa [#allocation5], 0 }
   0x7   :  { %16 = vsyncpa [#allocation5 + $0x1], 0  ;;  %s917_s12 = smov 0   ;;  %s919_s13 = smov 0  }
   0x8   :  { %s921_s14 = smov 0   ;;  %s923_s15 = smov 0  }
   0x9   :  { %s925_s16 = smov 0   ;;  %s927_s17 = smov 0  }
   0xa LB: > { %1199 = sst [smem:[#allocation13_spill]] %s883_s16  ;;  %s948_s18 = sadd.s32 4294967295, %s887_s17   ;;  %s887_s17 = sphi %s927_s17, %s22_s17   ;;  %s883_s16 = sphi %s925_s16, %s1219_s16   ;;  %s879_s15 = sphi %s923_s15, %s1218_s15   ;;  %s875_s14 = sphi %s921_s14, %s1222_s14   ;;  %s871_s13 = sphi %s919_s13, %s1221_s13   ;;  %s867_s12 = sphi %s917_s12, %s1220_s12  }
   0xb   : > { %s604_s19 = sadd.s32 4294967294, %s887_s17   ;;  %s41_s20 = sadd.s32 1, %s883_s16 }
   0xc   : > { %s60_s21 = sadd.s32 1, %s875_s14  ;;  %p43_p0 = scmp.ge.s32.totalorder %s41_s20, 2 }
   0xd   : > { %p67_p1 = scmp.ne.s32.totalorder %s875_s14, %s871_s13  ;;  %p68_p2 = scmp.eq.s32.totalorder %s887_s17, 0 }
   0xe   : > { %p73_p3 = scmp.ne.s32.totalorder %s871_s13, %s867_s12  ;;  %s1224_s20 = smov (%p43_p0, %s41_s20), 0 }
   0xf   : > { %1200 = sst [smem:[#allocation14_spill]] %s1224_s20  ;;  %p960_p4 = por %p68_p2, %p67_p1 }
  0x10   : > { %p74_p5 = scmp.eq.s32.totalorder %s948_s18, 0  ;;  %s53_s23 = ssub.s32 %s883_s16, %s1224_s20 }
  0x11   : > { %p169_p6 = scmp.eq.s32.totalorder %s948_s18, 1  ;;  %p58_p7 = scmp.eq.s32.totalorder %s53_s23, 0 }
  0x12   : > { %p968_p8 = por %p74_p5, %p73_p3  ;;  %p175_p10 = scmp.eq.s32.totalorder %s604_s19, 1 }
  0x13   : > { %p972_p9 = por %p169_p6, %p67_p1  ;;  %p657_p13 = scmp.lt.s32.totalorder %s887_s17, 2 }
  0x14   : > { %s1202_s24 = scalar_select %p968_p8, 1, 0 }
  0x15   : > { %s1203_s25 = scalar_select %p972_p9, 1, 0 }
  0x16   : > { %s977_s26 = scalar_select %p58_p7, %s875_s14, %s60_s21  }
  0x17   : > { %p979_p11 = por %p175_p10, %p73_p3  ;;  %s986_s28 = sand.u32 1, %s875_s14  }
  0x18   : > { %1204 = sst [smem:[#allocation15_spill]] %s977_s26  ;;  %s989_s29 = sshll.u32 %s883_s16, 8 }
  0x19   : > { %s1205_s27 = scalar_select %p979_p11, 1, 0 }
  0x1a   : > { %s220_s30 = sand.u32 1, %s887_s17   ;;  %p994_p0 = pnand %p657_p13, %p960_p4 }
  0x1b   : > { %s610_s5 = sshll.u32 %s986_s28, 4  ;;  %s1207_s1 = sld [smem:[#allocation16_spill]] }
  0x1c   : > { %s1206_s4 = scalar_select %p994_p0, 1, 0 }
  0x1d   : > { %s224_s9 = scalar_lea.vmem [#allocation6], %s610_s5  ;;  %s1007_s11 = scalar_lea.sflag [#allocation7], %s220_s30 }
  0x1e   : > { %s234_s10 = sshll.u32 %s224_s9, 4  ;;  %p1013_p2 = pneg %p994_p0  ;;  %s1005_s10 = int_to_ptr.vmem [resolvable:$true] %s234_s10 }
  0x21   : > { %s1003_s8 = scalar_lea.hbm %s1207_s1, %s989_s29  ;;  %s716_s5 = scalar_lea.hbm %s1207_s1, 512 }
  0x22   : > { %s711_s19 = scalar_lea.hbm %s1003_s8, 256  ;;  %p717_p5 = scmp.lt.u32.totalorder %s1003_s8, %s1207_s1 }
  0x23   : > { %p712_p1 = scmp.ne.s32.totalorder %s1003_s8, %s711_s19  ;;  %p718_p6 = scmp.lt.u32.totalorder %s716_s5, %s711_s19 }
  0x24   : > { %p720_p10 = scmp.lt.u32.totalorder %s711_s19, %s1003_s8 }
  0x25   : > { %p714_p3 = pnand %p1013_p2, %p712_p1  ;;  %p719_p7 = por %p718_p6, %p717_p5 }
  0x27   : > { %p715_p4 = pneg %p714_p3  ;;  %p721_p13 = por %p720_p10, %p719_p7 }
  0x29   : > { %p722_p12 = pnand %p721_p13, %p715_p4 }
  0x2b   : > { %725 = shalt.err (!%p722_p12)
}
  0x2c   : > { %s726_s30 = scalar_lea.vmem %s1005_s10, 256  ;;  %s889_s9 = smov [#allocation6]  }
  0x2d   : > { %p727_p1 = scmp.ne.s32.totalorder %s1005_s10, %s726_s30  ;;  %s731_s22 = sshll.u32 %s889_s9, 4  ;;  %s732_s22 = int_to_ptr.vmem [resolvable:$false] %s731_s22 }
  0x2e   : > { %s733_s23 = scalar_lea.vmem %s732_s22, 512  ;;  %p734_p9 = scmp.lt.s32.totalorder %s1005_s10, %s732_s22 }
  0x2f   : > { %p729_p3 = pnand %p727_p1, %p1013_p2  ;;  %p735_p8 = scmp.lt.s32.totalorder %s733_s23, %s726_s30 }
  0x31   : > { %p730_p11 = pneg %p729_p3  ;;  %p736_p5 = por %p735_p8, %p734_p9 }
  0x33   : > { %p737_p6 = pnand %p736_p5, %p730_p11 }
  0x35   : > { %740 = shalt.err (!%p737_p6)
}
  0x36   : > { %s890_s19 = smov 128   ;;  %s891_s5 = smov 8  }
  0x37   : > { %649 = dma.hbm_to_vmem [thread:$0]  (!%p994_p0), %s1003_s8, 256, %s1005_s10, %s1007_s11, %s890_s19, %s890_s19, %s891_s5  }
  0x38   : > { %p616_p12 = scmp.ge.s32.totalorder %s887_s17, 1  ;;  %p267_p8 = scmp.lt.s32.totalorder %s887_s17, 3 }
  0x39   : > { %s1196_s7 = sshll.u32 %s986_s28, 3  ;;  %s1048_s22 = scalar_lea.hbm %s1188_s0, %s989_s29 }
  0x3a   : > { %p1039_p9 = pnand %p616_p12, %p267_p8  ;;  %s199_s23 = scalar_lea.vmem [#allocation3], %s1196_s7 }
  0x3b   : > { %s213_s1 = sshll.u32 %s199_s23, 4  ;;  %s632_s8 = sadd.s32 128, %s989_s29  ;;  %s1053_s1 = int_to_ptr.vmem [resolvable:$true] %s213_s1 }
  0x3c   : > { %s1209_s6 = scalar_select %p1039_p9, 1, 0 }
  0x3d   : > { %s1058_s5 = scalar_lea.hbm %s1190_s2, %s632_s8  ;;  %s196_s20 = scalar_lea.sflag [#allocation4], %s986_s28 }
  0x3e   : > { %s741_s16 = scalar_lea.hbm %s1048_s22, 128  ;;  %s746_s26 = scalar_lea.hbm %s1188_s0, 512 }
  0x3f   : > { %p742_p11 = scmp.ne.s32.totalorder %s1048_s22, %s741_s16  ;;  %p747_p10 = scmp.lt.u32.totalorder %s1048_s22, %s1188_s0 }
  0x40   : > { %p748_p13 = scmp.lt.u32.totalorder %s746_s26, %s741_s16  ;;  %p750_p3 = scmp.lt.u32.totalorder %s741_s16, %s1048_s22 }
  0x41   : > { %p744_p4 = pnand %p742_p11, %p1013_p2 }
  0x42   : > { %p749_p1 = por %p748_p13, %p747_p10 }
  0x43   : > { %p745_p7 = pneg %p744_p4 }
  0x44   : > { %p751_p5 = por %p750_p3, %p749_p1 }
  0x46   : > { %p752_p6 = pnand %p751_p5, %p745_p7 }
  0x48   : > { %755 = shalt.err (!%p752_p6)
}
  0x49   : > { %s756_s29 = scalar_lea.vmem %s1053_s1, 128  ;;  %s892_s8 = smov [#allocation3]  }
  0x4a   : > { %p757_p12 = scmp.ne.s32.totalorder %s1053_s1, %s756_s29  ;;  %s761_s10 = sshll.u32 %s892_s8, 4  ;;  %s762_s10 = int_to_ptr.vmem [resolvable:$false] %s761_s10 }
  0x4b   : > { %s763_s7 = scalar_lea.vmem %s762_s10, 256  ;;  %p764_p4 = scmp.lt.s32.totalorder %s1053_s1, %s762_s10 }
  0x4c   : > { %p759_p8 = pnand %p757_p12, %p1013_p2  ;;  %p765_p9 = scmp.lt.s32.totalorder %s763_s7, %s756_s29 }
  0x4e   : > { %p760_p11 = pneg %p759_p8  ;;  %p766_p10 = por %p765_p9, %p764_p4 }
  0x50   : > { %p767_p13 = pnand %p766_p10, %p760_p11 }
  0x52   : > { %770 = shalt.err (!%p767_p13)
}
  0x53   : > { %646 = dma.hbm_to_vmem [thread:$0]  (!%p994_p0), %s1048_s22, 128, %s1053_s1, %s196_s20  }
  0x54   : > { %s1210_s16 = sshll.u32 %s986_s28, 3  ;;  %s771_s30 = scalar_lea.hbm %s1058_s5, 128 }
  0x55   : > { %s248_s26 = scalar_lea.vmem [#allocation8], %s1210_s16  ;;  %p772_p7 = scmp.ne.s32.totalorder %s1058_s5, %s771_s30 }
  0x56   : > { %s262_s19 = sshll.u32 %s248_s26, 4  ;;  %s776_s29 = scalar_lea.hbm %s1190_s2, 512  ;;  %s263_s19 = int_to_ptr.vmem [resolvable:$true] %s262_s19 }
  0x57   : > { %p774_p9 = pnand %p772_p7, %p1013_p2  ;;  %p777_p3 = scmp.lt.u32.totalorder %s1058_s5, %s1190_s2 }
  0x58   : > { %p778_p5 = scmp.lt.u32.totalorder %s776_s29, %s771_s30  ;;  %p780_p12 = scmp.lt.u32.totalorder %s771_s30, %s1058_s5 }
  0x59   : > { %p775_p1 = pneg %p774_p9 }
  0x5a   : > { %p779_p6 = por %p778_p5, %p777_p3 }
  0x5c   : > { %p781_p8 = por %p780_p12, %p779_p6 }
  0x5e   : > { %p782_p11 = pnand %p781_p8, %p775_p1 }
  0x60   : > { %785 = shalt.err (!%p782_p11)
}
  0x61   : > { %s786_s1 = scalar_lea.vmem %s263_s19, 128  ;;  %s893_s20 = smov [#allocation8]  }
  0x62   : > { %p787_p4 = scmp.ne.s32.totalorder %s263_s19, %s786_s1  ;;  %s791_s28 = sshll.u32 %s893_s20, 4  ;;  %s792_s28 = int_to_ptr.vmem [resolvable:$false] %s791_s28 }
  0x63   : > { %s793_s22 = scalar_lea.vmem %s792_s28, 256  ;;  %p794_p7 = scmp.lt.s32.totalorder %s263_s19, %s792_s28 }
  0x64   : > { %p789_p10 = pnand %p787_p4, %p1013_p2  ;;  %p795_p9 = scmp.lt.s32.totalorder %s793_s22, %s786_s1 }
  0x66   : > { %p790_p13 = pneg %p789_p10  ;;  %p796_p0 = por %p795_p9, %p794_p7 }
  0x68   : > { %p797_p3 = pnand %p796_p0, %p790_p13 }
  0x6a   : > { %800 = shalt.err (!%p797_p3)
}
  0x6b   : > { %p1211_p5 = scmp.ne.s32.totalorder %s1206_s4, 0  ;;  %p1212_p1 = scmp.ne.s32.totalorder %s1209_s6, 0 }
  0x6c   : > { %s1105_s21 = sand.u32 (!%p1212_p1), 1, %s871_s13   ;;  %p1213_p2 = scmp.ne.s32.totalorder (!%p1212_p1), %s1202_s24, 0 }
  0x6d   : > { %652 = dma.hbm_to_vmem [thread:$0]  (!%p1211_p5), %s1058_s5, 128, %s263_s19, %s1007_s11  }
  0x6e   : > { %271 = sbr.rel (%p1212_p1) target bundleno = 165 (0xa5), region = 32  ;;  %s617_s7 = sshll.u32 (!%p1212_p1), %s1105_s21, 3 }
  0x6f   : > { %s274_s16 = scalar_lea.sflag (!%p1212_p1), [#allocation4], %s1105_s21  ;;  %s277_s26 = scalar_lea.vmem (!%p1212_p1), [#allocation3], %s617_s7 }
  0x75   : > { %854 = dma.done.wait (%p1213_p2), %s274_s16, 128  }
  0x76   : > { %856 = vsyncadd (%p1213_p2), %s274_s16, 4294967168  ;;  %s282_s4 = sand.u32 1, %s948_s18   ;;  %s618_s11 = sshll.u32 %s1105_s21, 4 }
  0x77   : > { %s283_s6 = scalar_lea.sflag [#allocation7], %s282_s4  ;;  %s286_s5 = scalar_lea.vmem [#allocation6], %s618_s11 }
  0x78   : > { %858 = dma.done.wait (%p1213_p2), %s283_s6, 384  }
  0x79   : > { %860 = vsyncadd (%p1213_p2), %s283_s6, 4294966912  ;;  %vm340_vm0 = vcmask 261120   ;;  %v342_v0 = vld [vmem:[%s286_s5] sm:$0xff]  ;;  %v343_v1 = vld [vmem:[%s286_s5 + $0x8] sm:$0xff]  ;;  %s295_s18 = scalar_lea.vmem [#allocation8], %s617_s7  ;;  %s327_s24 = scalar_lea.vmem [#allocation9], %s618_s11 }
  0x7a   : > { %v339_v2 = vld [vmem:[%s277_s26] sm:$0xff]  ;;  %344 = vst.msk [vmem:[#allocation2 + $0x8] sm:$0xff] %vm340_vm0, %v342_v0  ;;  %345 = vst.msk [vmem:[#allocation2 + $0x10] sm:$0xff] %vm340_vm0, %v343_v1  ;;  %v346_v3 = vld [vmem:[%s295_s18] sm:$0xff]  ;;  %s461_s19 = sshll.u32 %s327_s24, 4  ;;  %s633_s30 = sshll.u32 %s879_s15, 8  ;;  %s1132_s19 = int_to_ptr.vmem [resolvable:$true] %s461_s19 }
  0x7b   : > { %341 = vst.msk [vmem:[#allocation2] sm:$0xff] %vm340_vm0, %v339_v2  ;;  %347 = vst.msk [vmem:[#allocation2 + $0x18] sm:$0xff] %vm340_vm0, %v346_v3  ;;  %s1137_s29 = scalar_lea.hbm %s1191_s3, %s633_s30  ;;  %s445_s8 = scalar_lea.sflag [#allocation5], %s1105_s21 }
  0x7c   : > { %s801_s15 = scalar_lea.vmem %s1132_s19, 256  ;;  %p1214_p6 = scmp.ne.s32.totalorder %s1203_s25, 0 }
  0x7d   : > { %p802_p0 = scmp.ne.s32.totalorder %s1132_s19, %s801_s15  ;;  %s894_s10 = smov [#allocation9]  }
  0x7e   : > { %s805_s1 = sshll.u32 %s894_s10, 4  ;;  %s806_s1 = int_to_ptr.vmem [resolvable:$false] %s805_s1 }
  0x7f   : > { %p803_p12 = pnand %p802_p0, %p1214_p6  ;;  %s807_s20 = scalar_lea.vmem %s806_s1, 512 }
  0x80   : > { %p808_p11 = scmp.lt.s32.totalorder %s1132_s19, %s806_s1  ;;  %p809_p4 = scmp.lt.s32.totalorder %s807_s20, %s801_s15 }
  0x81   : > { %v622_v4 = vld [vmem:[#allocation2 + $0x8] ss:$0 sm:$0xff]  ;;  %v623_v6 = vld [vmem:[#allocation2 + $0x17] ss:$0 sm:$0xff]  ;;  %p804_p8 = pneg %p803_p12 }
  0x82   : > { %v375_v5 = vld [vmem:[#allocation2 + $0x8] sm:$0xff]  ;;  %418 = vst.msk [vmem:[#allocation2] sm:$0xff] %vm340_vm0, %v622_v4  ;;  %v376_v7 = vld [vmem:[#allocation2 + $0x10] sm:$0xff]  ;;  %421 = vst.msk [vmem:[#allocation2 + $0x18] sm:$0xff] %vm340_vm0, %v623_v6  ;;  %p810_p10 = por %p809_p4, %p808_p11 }
  0x83   : > { %419 = vst.msk [vmem:[#allocation2 + $0x8] sm:$0xff] %vm340_vm0, %v375_v5  ;;  %420 = vst.msk [vmem:[#allocation2 + $0x10] sm:$0xff] %vm340_vm0, %v376_v7 }
  0x84   : > { %p811_p13 = pnand %p810_p10, %p804_p8 }
  0x8a   : > { %v422_v8 = vld [vmem:[#allocation2 + $0x6] sm:$0xff]  ;;  %v423_v11 = vld [vmem:[#allocation2 + $0xe] sm:$0xff] }
  0x8b   : > { %v424_v9 = vld [vmem:[#allocation2 + $0x7] sm:$0xff]  ;;  %v425_v13 = vld [vmem:[#allocation2 + $0xf] sm:$0xff] }
  0x8c   : > { %v426_v10 = vadd.f32 %v424_v9, %v422_v8  ;;  %v428_v12 = vld [vmem:[#allocation2 + $0x8] sm:$0xff]  ;;  %v427_v15 = vadd.f32 %v425_v13, %v423_v11  ;;  %v429_v17 = vld [vmem:[#allocation2 + $0x10] sm:$0xff] }
  0x8d   : > { %v432_v16 = vld [vmem:[#allocation2 + $0x9] sm:$0xff]  ;;  %v433_v21 = vld [vmem:[#allocation2 + $0x11] sm:$0xff] }
  0x8e   : > { %v430_v14 = vadd.f32 %v428_v12, %v426_v10  ;;  %v431_v19 = vadd.f32 %v429_v17, %v427_v15  ;;  %v436_v20 = vld [vmem:[#allocation2 + $0xa] sm:$0xff]  ;;  %v437_v24 = vld [vmem:[#allocation2 + $0x12] sm:$0xff] }
  0x90   : > { %v434_v18 = vadd.f32 %v432_v16, %v430_v14  ;;  %v435_v23 = vadd.f32 %v433_v21, %v431_v19 }
  0x92   : > { %v438_v22 = vadd.f32 %v436_v20, %v434_v18  ;;  %v439_v26 = vadd.f32 %v437_v24, %v435_v23 }
  0x94   : > { %v440_v25 = vmul.f32 0.2, %v438_v22  ;;  %v441_v27 = vmul.f32 0.2, %v439_v26 }
  0x96   : > { %442 = vst.msk [vmem:[%s327_s24] sm:$0xff] %vm340_vm0, %v440_v25  ;;  %443 = vst.msk [vmem:[%s327_s24 + $0x8] sm:$0xff] %vm340_vm0, %v441_v27 }
  0x97   : > { %814 = shalt.err (!%p811_p13)
}
  0x98   : > { %s815_s28 = scalar_lea.hbm %s1137_s29, 256  ;;  %s819_s16 = scalar_lea.hbm %s1191_s3, 512 }
  0x99   : > { %p816_p7 = scmp.ne.s32.totalorder %s1137_s29, %s815_s28  ;;  %p820_p5 = scmp.lt.u32.totalorder %s1137_s29, %s1191_s3 }
  0x9a   : > { %p821_p1 = scmp.lt.u32.totalorder %s819_s16, %s815_s28  ;;  %p823_p0 = scmp.lt.u32.totalorder %s815_s28, %s1137_s29 }
  0x9b   : > { %p817_p9 = pnand %p816_p7, %p1214_p6 }
  0x9c   : > { %p822_p2 = por %p821_p1, %p820_p5 }
  0x9d   : > { %p818_p3 = pneg %p817_p9 }
  0x9e   : > { %p824_p12 = por %p823_p0, %p822_p2 }
  0xa0   : > { %p825_p8 = pnand %p824_p12, %p818_p3 }
  0xa2   : > { %828 = shalt.err (!%p825_p8)
}
  0xa3   : > { %s895_s11 = smov 128   ;;  %s896_s6 = smov 8  }
  0xa4   : > { %641 = dma.vmem_to_hbm [thread:$0]  (%p1214_p6), %s1132_s19, 256, %s1137_s29, %s445_s8, %s895_s11, %s895_s11, %s896_s6  }
  0xa5 PF: > { %s476_s5 = sand.u32 1, %s867_s12   ;;  %p1215_p11 = scmp.ne.s32.totalorder %s1205_s27, 0 }
  0xa6   : > { %p1216_p4 = scmp.ge.s32.totalorder %s887_s17, 2  ;;  %s477_s18 = scalar_lea.sflag [#allocation5], %s476_s5 }
  0xa8   : > { %p654_p10 = pnand %p1216_p4, %p1215_p11 }
  0xaa   : > { %862 = dma.done.wait (!%p654_p10), %s477_s18, 256  }
  0xab   : > { %864 = vsyncadd (!%p654_p10), %s477_s18, 4294967040  ;;  %s22_s17 = sadd.s32 1, %s887_s17   ;;  %s1217_s24 = sld [smem:[#allocation15_spill]] }
  0xac   : > { %p19_p13 = scmp.ge.s32.totalorder %s22_s17, 4   ;;  %s1218_s15 = sld [smem:[#allocation13_spill]] }
  0xad   : > { %s1219_s16 = sld [smem:[#allocation14_spill]]  ;;  %s1220_s12 = smov %s871_s13 }
  0xae   : > { %s1221_s13 = smov %s875_s14  ;;  %21 = sbr.rel (!%p19_p13) target bundleno = 10 (0xa), region = 106 }
  0xb1   : > { %s1222_s14 = smov %s1217_s24 }
  0xb5   :  { %482 = vsyncpa [#allocation4], 1 }
  0xb6   :  { %484 = vsyncpa [#allocation4 + $0x1], 1 }
  0xb7   :  { %485 = vsyncpa [#allocation7], 1 }
  0xb8   :  { %487 = vsyncpa [#allocation7 + $0x1], 1 }
  0xb9   :  { %488 = vsyncpa [#allocation5], 1 }
  0xba   :  { %490 = vsyncpa [#allocation5 + $0x1], 1 }

</bundles_post_ra>
